<compile_context>
chip_gen: v5e
topology: v5e:2x2
jax: 0.10.0
libtpu: 0.0.40
codegen_flags: <defaults>
</compile_context>

<pallas_src>
import jax
import jax.numpy as jnp
from jax.experimental import pallas as pl
from jax.experimental.pallas import tpu as pltpu

EPS = 1e-5  # nn.BatchNorm1d default eps


# --------------------------------------------------------------------------- #
# Pass 1: per-batch-tile sums for BatchNorm statistics
# --------------------------------------------------------------------------- #
def _stats_kernel(x_ref, w1_ref, b1_ref, stats_ref):
    # h = x @ W1 + b1   (bf16 MXU inputs, f32 accumulate)
    h = jnp.dot(x_ref[...].astype(jnp.bfloat16), w1_ref[...],
                preferred_element_type=jnp.float32) + b1_ref[...]
    # Single pass over h: sum and sum-of-squares (var = E[h^2] - mean^2 later).
    s1 = jnp.sum(h, axis=0, keepdims=True)       # (1, H)
    s2 = jnp.sum(h * h, axis=0, keepdims=True)   # (1, H)
    stats_ref[...] = jnp.concatenate([s1, s2], axis=0)[None]   # (1, 2, H)


# --------------------------------------------------------------------------- #
# Pass 2: normalize (fused scale/shift), ReLU, second Linear, residual blend
# --------------------------------------------------------------------------- #
def _apply_kernel(coeff_ref, x_ref, w1_ref, b1_ref, scale_ref, shift_ref,
                  w2_ref, b2_ref, o_ref):
    c = coeff_ref[0]                              # hoist scalar read before matmuls
    x = x_ref[...]                                # (TB, Din) f32
    h = jnp.dot(x.astype(jnp.bfloat16), w1_ref[...],
                preferred_element_type=jnp.float32) + b1_ref[...]
    h = h * scale_ref[...] + shift_ref[...]       # fused BN scale/shift (2 VPU ops/elem)
    h = jnp.maximum(h, 0.0)                       # ReLU
    y = jnp.dot(h.astype(jnp.bfloat16), w2_ref[...],
                preferred_element_type=jnp.float32) + b2_ref[...]
    o_ref[...] = x + c * (y - x)                  # residual blend


# --------------------------------------------------------------------------- #
# Wrapper
# --------------------------------------------------------------------------- #
def fully_connected2(x, w1_t, b1, gamma, beta, w2_t, b2, coeff, *, block_b=128):
    """x: (B, in_dim) f32; w1_t: (in_dim, hid); w2_t: (hid, out_dim == in_dim)."""
    B, Din = x.shape
    H = w1_t.shape[1]
    Dout = w2_t.shape[1]
    assert Dout == Din, "residual blend requires out_dim == in_dim"

    tb = block_b if (B % block_b == 0) else B     # batch tile
    nbt = B // tb

    # bf16 weights: native MXU input dtype, half the weight VMEM/HBM traffic.
    w1_bf = w1_t.astype(jnp.bfloat16)
    w2_bf = w2_t.astype(jnp.bfloat16)
    b1r = b1.reshape(1, H).astype(jnp.float32)
    b2r = b2.reshape(1, Dout).astype(jnp.float32)

    cp = pltpu.CompilerParams(
        dimension_semantics=("parallel",),        # v7x: 2 TCs split the batch tiles
        vmem_limit_bytes=32 * 1024 * 1024,        # explicit; safe on v5e/v6e/v7x
    )

    # ---- pass 1: per-tile partial sums ------------------------------------
    stats = pl.pallas_call(
        _stats_kernel,
        out_shape=jax.ShapeDtypeStruct((nbt, 2, H), jnp.float32),
        grid_spec=pltpu.PrefetchScalarGridSpec(
            num_scalar_prefetch=0,
            grid=(nbt,),
            in_specs=[
                pl.BlockSpec((tb, Din), lambda i: (i, 0)),
                pl.BlockSpec((Din, H), lambda i: (0, 0)),    # W1 resident
                pl.BlockSpec((1, H), lambda i: (0, 0)),      # b1 resident
            ],
            out_specs=pl.BlockSpec((1, 2, H), lambda i: (i, 0, 0)),
        ),
        compiler_params=cp,
        cost_estimate=pl.CostEstimate(
            flops=2 * B * Din * H,
            transcendentals=0,
            bytes_accessed=4 * B * Din + 2 * Din * H + 4 * H + 4 * nbt * 2 * H),
    )(x, w1_bf, b1r)

    # ---- tiny glue: fold batch stats into one scale/shift ------------------
    sums = jnp.sum(stats, axis=0)                       # (2, H) — global over batch
    mean = sums[0] / B
    var = jnp.maximum(sums[1] / B - mean * mean, 0.0)   # biased variance (train mode)
    inv = jax.lax.rsqrt(var + EPS)
    scale = (gamma * inv).reshape(1, H).astype(jnp.float32)
    shift = (beta - mean * gamma * inv).reshape(1, H).astype(jnp.float32)

    # ---- pass 2: normalize + ReLU + Linear2 + residual blend ----------------
    out = pl.pallas_call(
        _apply_kernel,
        out_shape=jax.ShapeDtypeStruct((B, Din), jnp.float32),
        grid_spec=pltpu.PrefetchScalarGridSpec(
            num_scalar_prefetch=0,
            grid=(nbt,),
            in_specs=[
                pl.BlockSpec(memory_space=pltpu.MemorySpace.SMEM),   # coeff scalar
                pl.BlockSpec((tb, Din), lambda i: (i, 0)),
                pl.BlockSpec((Din, H), lambda i: (0, 0)),            # W1 resident
                pl.BlockSpec((1, H), lambda i: (0, 0)),              # b1
                pl.BlockSpec((1, H), lambda i: (0, 0)),              # scale
                pl.BlockSpec((1, H), lambda i: (0, 0)),              # shift
                pl.BlockSpec((H, Dout), lambda i: (0, 0)),           # W2 resident
                pl.BlockSpec((1, Dout), lambda i: (0, 0)),           # b2
            ],
            out_specs=pl.BlockSpec((tb, Din), lambda i: (i, 0)),
        ),
        compiler_params=cp,
        cost_estimate=pl.CostEstimate(
            flops=2 * B * Din * H + 2 * B * H * Dout,
            transcendentals=0,
            bytes_accessed=(4 * B * Din + 2 * Din * H + 2 * H * Dout
                            + 4 * (3 * H + Dout) + 4 * B * Dout)),
    )(coeff, x, w1_bf, b1r, scale, shift, w2_bf, b2r)
    return out


# --------------------------------------------------------------------------- #
# References
# --------------------------------------------------------------------------- #
def reference_f32(x, w1_t, b1, gamma, beta, w2_t, b2, coeff):
    """Pure-f32 reference matching the PyTorch module's forward."""
    h = x @ w1_t + b1
    mean = h.mean(axis=0)
    var = ((h - mean) ** 2).mean(axis=0)
    h = (h - mean) / jnp.sqrt(var + EPS) * gamma + beta
    h = jnp.maximum(h, 0.0)
    y = h @ w2_t + b2
    return coeff[0] * y + (1.0 - coeff[0]) * x


def reference_mirrored(x, w1_t, b1, gamma, beta, w2_t, b2, coeff):
    """Reference using the same numerics as the kernel (bf16 MXU inputs, f32 acc)."""
    h = jnp.dot(x.astype(jnp.bfloat16), w1_t.astype(jnp.bfloat16),
                preferred_element_type=jnp.float32) + b1
    mean = h.mean(axis=0)
    var = jnp.maximum((h * h).mean(axis=0) - mean * mean, 0.0)
    inv = jax.lax.rsqrt(var + EPS)
    h = h * (gamma * inv) + (beta - mean * gamma * inv)
    h = jnp.maximum(h, 0.0)
    y = jnp.dot(h.astype(jnp.bfloat16), w2_t.astype(jnp.bfloat16),
                preferred_element_type=jnp.float32) + b2
    return x + coeff[0] * (y - x)


if __name__ == "__main__":
    # Lane-dense small shapes (128-multiples); residual blend forces out_dim == in_dim.
    B, in_dim, hid_dim1, out_dim = 256, 128, 256, 128
    par = 0.7

    key = jax.random.PRNGKey(0)
    k = jax.random.split(key, 8)

    x = jax.random.normal(k[0], (B, in_dim), dtype=jnp.float32)

    # PyTorch-style uniform(-1/sqrt(fan_in), 1/sqrt(fan_in)) init.
    bnd1 = 1.0 / jnp.sqrt(float(in_dim))
    w1 = jax.random.uniform(k[1], (hid_dim1, in_dim), minval=-bnd1, maxval=bnd1)
    b1 = jax.random.uniform(k[2], (hid_dim1,), minval=-bnd1, maxval=bnd1)
    bnd2 = 1.0 / jnp.sqrt(float(hid_dim1))
    w2 = jax.random.uniform(k[3], (out_dim, hid_dim1), minval=-bnd2, maxval=bnd2)
    b2 = jax.random.uniform(k[4], (out_dim,), minval=-bnd2, maxval=bnd2)
    gamma = jax.random.uniform(k[5], (hid_dim1,), minval=0.5, maxval=1.5)
    beta = jax.random.uniform(k[6], (hid_dim1,), minval=-0.5, maxval=0.5)
    coeff = jnp.array([par], dtype=jnp.float32)

    w1_t = w1.T  # (in_dim, hid_dim1)
    w2_t = w2.T  # (hid_dim1, out_dim)

    out = fully_connected2(x, w1_t, b1, gamma, beta, w2_t, b2, coeff)
    out = jax.block_until_ready(out)

    ref_bf = reference_mirrored(x, w1_t, b1, gamma, beta, w2_t, b2, coeff)
    ref_f32 = reference_f32(x, w1_t, b1, gamma, beta, w2_t, b2, coeff)

    assert out.shape == (B, in_dim)
    # Tight check vs a reference with identical numerics (bf16 MXU inputs).
    assert jnp.allclose(out, ref_bf, atol=3e-3, rtol=3e-3), "mismatch vs bf16-mirrored reference"
    # Loose check vs the pure-f32 module semantics (bf16 matmul precision margin).
    assert jnp.allclose(out, ref_f32, atol=5e-2, rtol=0.0), "mismatch vs f32 reference"

    print("KERNEL_OK")
</pallas_src>

<mosaic_0001>
module attributes {stable_mosaic.version = 11 : i64} {
  func.func @_stats_kernel(%arg0: i32, %arg1: memref<128x128xf32, #tpu.memory_space<vmem>>, %arg2: memref<128x256xbf16, #tpu.memory_space<vmem>>, %arg3: memref<1x256xf32, #tpu.memory_space<vmem>>, %arg4: memref<1x2x256xf32, #tpu.memory_space<vmem>>) attributes {dimension_semantics = [#tpu.dimension_semantics<parallel>], iteration_bounds = array<i64: 2>, scalar_prefetch = 0 : i64, scratch_operands = 0 : i64, tpu.core_type = #tpu.core_type<tc>, window_params = [{transform_indices = @transform_0, window_bounds = array<i64: 128, 128>}, {pipeline_mode = #tpu.pipeline_mode<synchronous>, transform_indices = @transform_1, window_bounds = array<i64: 128, 256>}, {pipeline_mode = #tpu.pipeline_mode<synchronous>, transform_indices = @transform_2, window_bounds = array<i64: 1, 256>}, {transform_indices = @transform_3, window_bounds = array<i64: 1, 2, 256>}]} {
    %c0 = arith.constant 0 : index
    %c0_0 = arith.constant 0 : index
    %0 = vector.load %arg1[%c0, %c0_0] : memref<128x128xf32, #tpu.memory_space<vmem>>, vector<128x128xf32>
    %1 = arith.truncf %0 : vector<128x128xf32> to vector<128x128xbf16>
    %c0_1 = arith.constant 0 : index
    %c0_2 = arith.constant 0 : index
    %2 = vector.load %arg2[%c0_1, %c0_2] : memref<128x256xbf16, #tpu.memory_space<vmem>>, vector<128x256xbf16>
    %cst = arith.constant dense<0.000000e+00> : vector<128x256xf32>
    %3 = tpu.matmul %1, %2, %cst {dimension_numbers = #tpu.dot_dimension_numbers<[1], [0], [0], [1], [0, 0, 1, 1], [], []>} : vector<128x128xbf16>, vector<128x256xbf16>, vector<128x256xf32> -> vector<128x256xf32>
    %c0_3 = arith.constant 0 : index
    %c0_4 = arith.constant 0 : index
    %4 = vector.load %arg3[%c0_3, %c0_4] : memref<1x256xf32, #tpu.memory_space<vmem>>, vector<1x256xf32>
    %5 = vector.broadcast %4 : vector<1x256xf32> to vector<128x256xf32>
    %6 = arith.addf %3, %5 : vector<128x256xf32>
    %cst_5 = arith.constant dense<0.000000e+00> : vector<256xf32>
    %7 = vector.multi_reduction <add>, %6, %cst_5 [0] : vector<128x256xf32> to vector<256xf32>
    %8 = vector.shape_cast %7 : vector<256xf32> to vector<1x256xf32>
    %9 = arith.mulf %6, %6 : vector<128x256xf32>
    %cst_6 = arith.constant dense<0.000000e+00> : vector<256xf32>
    %10 = vector.multi_reduction <add>, %9, %cst_6 [0] : vector<128x256xf32> to vector<256xf32>
    %11 = vector.shape_cast %10 : vector<256xf32> to vector<1x256xf32>
    %12 = tpu.concatenate %8, %11 in 0 : vector<1x256xf32>, vector<1x256xf32> -> vector<2x256xf32>
    %13 = vector.shape_cast %12 : vector<2x256xf32> to vector<1x2x256xf32>
    %c0_7 = arith.constant 0 : index
    %c0_8 = arith.constant 0 : index
    %c0_9 = arith.constant 0 : index
    %14 = vector.load %arg4[%c0_7, %c0_8, %c0_9] : memref<1x2x256xf32, #tpu.memory_space<vmem>>, vector<1x2x256xf32>
    tpu.vector_store %arg4[%c0_7, %c0_8, %c0_9], %13 {strides = array<i32>} : memref<1x2x256xf32, #tpu.memory_space<vmem>>, vector<1x2x256xf32>,
    return
  }
  func.func @transform_0(%arg0: i32) -> (i32, i32) {
    %c0_i32 = arith.constant 0 : i32
    %c0_i32_0 = arith.constant 0 : i32
    return %arg0, %c0_i32 : i32, i32
  }
  func.func @transform_1(%arg0: i32) -> (i32, i32) {
    %c0_i32 = arith.constant 0 : i32
    %c0_i32_0 = arith.constant 0 : i32
    %c0_i32_1 = arith.constant 0 : i32
    return %c0_i32, %c0_i32_0 : i32, i32
  }
  func.func @transform_2(%arg0: i32) -> (i32, i32) {
    %c0_i32 = arith.constant 0 : i32
    %c0_i32_0 = arith.constant 0 : i32
    %c0_i32_1 = arith.constant 0 : i32
    return %c0_i32, %c0_i32_0 : i32, i32
  }
  func.func @transform_3(%arg0: i32) -> (i32, i32, i32) {
    %c0_i32 = arith.constant 0 : i32
    %c0_i32_0 = arith.constant 0 : i32
    %c0_i32_1 = arith.constant 0 : i32
    return %arg0, %c0_i32, %c0_i32_0 : i32, i32, i32
  }
}

</mosaic_0001>

<bundles_post_ra>
// kernel: tpu_custom_call.1
= control target key start
LH: loop header
LB: loop body
LE: loop exit
PB: predicated region body
PF: predicated region fallthrough
CT: control target
= control target key end

     0   :  { %8 = vsyncpa [#allocation3], 0  ;;  %s1288_s0 = inlined_call_operand.hbm [shape: f32[256,128], index: 0, kind: input, shape index: {}]   ;;  %s1289_s1 = inlined_call_operand.hbm [shape: bf16[128,256], index: 1, kind: input, shape index: {}]   ;;  %s1290_s2 = inlined_call_operand.hbm [shape: f32[1,256], index: 2, kind: input, shape index: {}]   ;;  %s1291_s3 = inlined_call_operand.hbm [shape: f32[2,2,256], index: 3, kind: output, shape index: {}]  }
   0x1   :  { %10 = vsyncpa [#allocation3 + $0x1], 0 }
   0x2   :  { %11 = vsyncpa [#allocation6], 0 }
   0x3   :  { %12 = vsyncpa [#allocation4], 0 }
   0x4   :  { %14 = vsyncpa [#allocation4 + $0x1], 0  ;;  %s1050_s12 = smov 0   ;;  %s1052_s13 = smov 0  }
   0x5   :  { %s1054_s14 = smov 0   ;;  %s1056_s15 = smov 0  }
   0x6 LB: > { %s1071_s16 = sadd.s32 4294967295, %s1024_s15   ;;  %s679_s17 = sadd.s32 4294967294, %s1024_s15   ;;  %s1024_s15 = sphi %s1056_s15, %s1301_s15   ;;  %s1020_s14 = sphi %s1054_s14, %s1300_s14   ;;  %s1016_s13 = sphi %s1052_s13, %s1299_s13   ;;  %s1012_s12 = sphi %s1050_s12, %s1298_s12  }
   0x7   : > { %p40_p0 = scmp.ne.s32.totalorder %s1016_s13, %s1012_s12  ;;  %p41_p1 = scmp.eq.s32.totalorder %s1071_s16, 0 }
   0x8   : > { %p106_p2 = scmp.eq.s32.totalorder %s1071_s16, 1  ;;  %p112_p3 = scmp.eq.s32.totalorder %s679_s17, 1 }
   0x9   : > { %p1080_p4 = por %p41_p1, %p40_p0  ;;  %p680_p5 = scmp.ge.s32.totalorder %s1024_s15, 1 }
   0xa   : > { %p1085_p6 = por %p112_p3, %p40_p0  ;;  %p119_p7 = scmp.lt.s32.totalorder %s1024_s15, 3 }
   0xb   : > { %s130_s22 = sshll.u32 %s1289_s1, 4  ;;  %s1026_s24 = smov [#allocation5]   ;;  %s131_s22 = int_to_ptr.hbm [resolvable:$true] %s130_s22 }
   0xc   : > { %p1093_p8 = pnand %p680_p5, %p119_p7  ;;  %s132_s25 = sshll.u32 %s1026_s24, 4  ;;  %s133_s25 = int_to_ptr.vmem [resolvable:$true] %s132_s25 }
   0xd   : > { %s145_s28 = sshll.u32 %s1290_s2, 4  ;;  %s1027_s29 = smov 128   ;;  %s146_s28 = int_to_ptr.hbm [resolvable:$true] %s145_s28 }
   0xe   : > { %p807_p9 = pneg %p1093_p8  ;;  %s1028_s30 = smov 8  }
   0xf   : > { %s1029_s4 = smov [#allocation7]   ;;  %s1109_s6 = sadd.s32 1, %s1024_s15  }
  0x10   : > { %p808_p10 = pnand %p807_p9, %p41_p1  ;;  %s147_s5 = sshll.u32 %s1029_s4, 4  ;;  %s148_s5 = int_to_ptr.vmem [resolvable:$true] %s147_s5 }
  0x11   : > { %s27_s7 = sadd.s32 1, %s1020_s14  ;;  %s24_s8 = ssub.s32 %s1024_s15, %s1109_s6 }
  0x12   : > { %810 = dma.hbm_to_vmem [thread:$0]  (!%p808_p10), %s131_s22, 2048, %s133_s25, [#allocation6], %s1027_s29, %s1027_s29, %s1028_s30  }
  0x13   : > { %813 = dma.hbm_to_vmem [thread:$0]  (!%p808_p10), %s146_s28, 32, %s148_s5, [#allocation6]  }
  0x14   : > { %p34_p12 = scmp.ne.s32.totalorder %s1020_s14, %s1016_s13  ;;  %p25_p13 = scmp.eq.s32.totalorder %s24_s8, 0 }
  0x15   : > { %p35_p0 = scmp.eq.s32.totalorder %s1024_s15, 0  ;;  %p824_p5 = scmp.lt.s32.totalorder %s1024_s15, 2 }
  0x16   : > { %p1119_p3 = por %p106_p2, %p34_p12  ;;  %s158_s11 = sand.u32 1, %s1020_s14  }
  0x17   : > { %s1125_s10 = scalar_select %p25_p13, %s1020_s14, %s27_s7  }
  0x18   : > { %p36_p7 = por %p35_p0, %p34_p12  ;;  %s684_s17 = sshll.u32 %s158_s11, 7 }
  0x19   : > { %s761_s20 = sshll.u32 %s1024_s15, 7  ;;  %s162_s25 = scalar_lea.vmem [#allocation2], %s684_s17 }
  0x1a   : > { %s167_s24 = scalar_lea.hbm %s1288_s0, %s761_s20  ;;  %s170_s26 = sshll.u32 %s162_s25, 4  ;;  %s171_s26 = int_to_ptr.vmem [resolvable:$true] %s170_s26 }
  0x1b   : > { %s168_s27 = sshll.u32 %s167_s24, 4  ;;  %p1132_p2 = pnand %p824_p5, %p36_p7  ;;  %s169_s27 = int_to_ptr.hbm [resolvable:$true] %s168_s27 }
  0x1c   : > { %s159_s4 = scalar_lea.sflag [#allocation3], %s158_s11  ;;  %s924_s5 = sshra.s32 %s169_s27, 4  ;;  %s925_s5 = int_to_ptr.hbm [resolvable:$true] %s924_s5 }
  0x1d   : > { %s926_s7 = scalar_lea.hbm %s925_s5, 128  ;;  %p928_p10 = pneg %p1132_p2 }
  0x1e   : > { %p927_p9 = scmp.ne.s32.totalorder %s925_s5, %s926_s7  ;;  %s931_s20 = scalar_lea.hbm %s1288_s0, 256 }
  0x1f   : > { %p932_p0 = scmp.lt.s32.totalorder %s925_s5, %s1288_s0  ;;  %p933_p5 = scmp.lt.s32.totalorder %s931_s20, %s926_s7 }
  0x20   : > { %p929_p12 = pnand %p928_p10, %p927_p9 }
  0x21   : > { %p934_p7 = por %p933_p5, %p932_p0 }
  0x22   : > { %p930_p13 = pneg %p929_p12 }
  0x24   : > { %p935_p11 = pnand %p934_p7, %p930_p13 }
  0x26   : > { %938 = shalt.err (!%p935_p11)
}
  0x27   : > { %817 = dma.hbm_to_vmem [thread:$0]  (!%p1132_p2), %s169_s27, 2048, %s171_s26, %s159_s4, %s1027_s29, %s1027_s29, %s1028_s30  }
  0x28   : > { %182 = sbr.rel (%p1093_p8) target bundleno = 306 (0x132), region = 32  ;;  %s1152_s11 = sand.u32 (!%p1093_p8), 1, %s1016_s13  }
  0x29   : > { %s688_s24 = sshll.u32 (!%p1093_p8), %s1152_s11, 7  ;;  %s185_s25 = scalar_lea.sflag (!%p1093_p8), [#allocation3], %s1152_s11 }
  0x2a   : > { %s1156_s5 = scalar_lea.vmem (!%p1093_p8), [#allocation2], %s688_s24 }
  0x2d   : > { %999 = dma.done.wait (%p1080_p4), %s185_s25, 2048  }
  0x2e   : > { %1001 = vsyncadd (%p1080_p4), %s185_s25, 4294965248 }
  0x2f   : > { %1003 = dma.done.wait (%p41_p1), [#allocation6], 2080  }
  0x30   : > { %1005 = vsyncadd (%p41_p1), [#allocation6], 4294965216  ;;  %v750_v0 = vld [vmem:[#allocation5 + $0x70] sm:$0xf]  ;;  %v777_v1 = vld [vmem:[#allocation5 + $0x74] sm:$0xf0] }
  0x31   : > { %v776_v2 = vld [vmem:[#allocation5 + $0x74] sm:$0xf]  ;;  %v751_v3 = vor.u32 %v777_v1, %v750_v0  ;;  %v752_v4 = vld [vmem:[#allocation5 + $0x78] sm:$0xf0]  ;;  %v742_v5 = vld [vmem:[#allocation5 + $0x60] sm:$0xf] }
  0x32   : > { %v775_v6 = vld [vmem:[#allocation5 + $0x64] sm:$0xf0]  ;;  %v755_v7 = vor.u32 %v776_v2, %v752_v4  ;;  %v774_v8 = vld [vmem:[#allocation5 + $0x64] sm:$0xf]  ;;  %v744_v9 = vld [vmem:[#allocation5 + $0x68] sm:$0xf0] }
  0x33   : > { %349 = vmatpush.bf16.msra.mxu0 %v751_v3  ;;  %779 = vmatpush.bf16.msra.mxu2 %v751_v3  ;;  %v743_v10 = vor.u32 %v775_v6, %v742_v5  ;;  %v747_v11 = vor.u32 %v774_v8, %v744_v9  ;;  %v734_v12 = vld [vmem:[#allocation5 + $0x50] sm:$0xf]  ;;  %v773_v13 = vld [vmem:[#allocation5 + $0x54] sm:$0xf0]  ;;  %v772_v14 = vld [vmem:[#allocation5 + $0x54] sm:$0xf] }
  0x34   : > { %398 = vmatpush.bf16.msra.mxu1 %v755_v7  ;;  %787 = vmatpush.bf16.msra.mxu3 %v755_v7  ;;  %v736_v15 = vld [vmem:[#allocation5 + $0x58] sm:$0xf0]  ;;  %v735_v16 = vor.u32 %v773_v13, %v734_v12  ;;  %v726_v18 = vld [vmem:[#allocation5 + $0x40] sm:$0xf]  ;;  %v771_v19 = vld [vmem:[#allocation5 + $0x44] sm:$0xf0] }
  0x35   : > { %v739_v17 = vor.u32 %v772_v14, %v736_v15  ;;  %v770_v20 = vld [vmem:[#allocation5 + $0x44] sm:$0xf]  ;;  %v728_v21 = vld [vmem:[#allocation5 + $0x48] sm:$0xf0]  ;;  %v727_v22 = vor.u32 %v771_v19, %v726_v18  ;;  %v718_v24 = vld [vmem:[#allocation5 + $0x30] sm:$0xf] }
  0x36   : > { %v731_v23 = vor.u32 %v770_v20, %v728_v21  ;;  %v769_v25 = vld [vmem:[#allocation5 + $0x34] sm:$0xf0]  ;;  %v768_v26 = vld [vmem:[#allocation5 + $0x34] sm:$0xf]  ;;  %v720_v27 = vld [vmem:[#allocation5 + $0x38] sm:$0xf0] }
  0x37   : > { %350 = vmatpush.bf16.msra.mxu0 %v743_v10  ;;  %780 = vmatpush.bf16.msra.mxu2 %v743_v10  ;;  %v719_v28 = vor.u32 %v769_v25, %v718_v24  ;;  %v723_v29 = vor.u32 %v768_v26, %v720_v27  ;;  %v710_v30 = vld [vmem:[#allocation5 + $0x20] sm:$0xf]  ;;  %v767_v31 = vld [vmem:[#allocation5 + $0x24] sm:$0xf0]  ;;  %v766_v32 = vld [vmem:[#allocation5 + $0x24] sm:$0xf] }
  0x38   : > { %399 = vmatpush.bf16.msra.mxu1 %v747_v11  ;;  %788 = vmatpush.bf16.msra.mxu3 %v747_v11  ;;  %v712_v33 = vld [vmem:[#allocation5 + $0x28] sm:$0xf0]  ;;  %v711_v34 = vor.u32 %v767_v31, %v710_v30  ;;  %v702_v36 = vld [vmem:[#allocation5 + $0x10] sm:$0xf]  ;;  %v765_v37 = vld [vmem:[#allocation5 + $0x14] sm:$0xf0] }
  0x39   : > { %v715_v35 = vor.u32 %v766_v32, %v712_v33  ;;  %v764_v38 = vld [vmem:[#allocation5 + $0x14] sm:$0xf]  ;;  %v704_v39 = vld [vmem:[#allocation5 + $0x18] sm:$0xf0]  ;;  %v703_v40 = vor.u32 %v765_v37, %v702_v36  ;;  %v694_v42 = vld [vmem:[#allocation5] sm:$0xf] }
  0x3a   : > { %v707_v41 = vor.u32 %v764_v38, %v704_v39  ;;  %v763_v43 = vld [vmem:[#allocation5 + $0x4] sm:$0xf0]  ;;  %v762_v44 = vld [vmem:[#allocation5 + $0x4] sm:$0xf]  ;;  %v696_v45 = vld [vmem:[#allocation5 + $0x8] sm:$0xf0] }
  0x3b   : > { %351 = vmatpush.bf16.msra.mxu0 %v735_v16  ;;  %781 = vmatpush.bf16.msra.mxu2 %v735_v16  ;;  %v695_v46 = vor.u32 %v763_v43, %v694_v42  ;;  %v223_v47 = vld [vmem:[%s1156_s5] sm:$0xff]  ;;  %v224_v48 = vld [vmem:[%s1156_s5 + $0x8] sm:$0xff]  ;;  %v699_v49 = vor.u32 %v762_v44, %v696_v45  ;;  %v225_v54 = vld [vmem:[%s1156_s5 + $0x10] sm:$0xff]  ;;  %s691_s18 = sshll.u32 %s1152_s11, 2  ;;  %s778_s23 = sshll.u32 %s1071_s16, 2  ;;  %vm563_vm0 = vcmask 1040384  }
  0x3c   : > { %400 = vmatpush.bf16.msra.mxu1 %v739_v17  ;;  %789 = vmatpush.bf16.msra.mxu3 %v739_v17  ;;  %v231_v50 = vld [vmem:[%s1156_s5 + $0x40] sm:$0xff]  ;;  %v232_v51 = vld [vmem:[%s1156_s5 + $0x48] sm:$0xff]  ;;  %v239_v52 = vpack.c.bf16 %v224_v48, %v223_v47  ;;  %v226_v55 = vld [vmem:[%s1156_s5 + $0x18] sm:$0xff]  ;;  %s585_s26 = scalar_lea.hbm %s1291_s3, %s778_s23  ;;  %s221_s27 = scalar_lea.vmem [#allocation8], %s691_s18  ;;  %vm569_vm1 = vcmask 1041408  }
  0x3d   : > { %v243_v53 = vpack.c.bf16 %v232_v51, %v231_v50  ;;  %v233_v56 = vld [vmem:[%s1156_s5 + $0x50] sm:$0xff]  ;;  %v234_v57 = vld [vmem:[%s1156_s5 + $0x58] sm:$0xff]  ;;  %v240_v58 = vpack.c.bf16 %v226_v55, %v225_v54  ;;  %v227_v60 = vld [vmem:[%s1156_s5 + $0x20] sm:$0xff]  ;;  %s587_s28 = sshll.u32 %s221_s27, 4  ;;  %s589_s4 = sshll.u32 %s585_s26, 4  ;;  %s588_s28 = int_to_ptr.vmem [resolvable:$true] %s587_s28  ;;  %s590_s4 = int_to_ptr.hbm [resolvable:$true] %s589_s4 }
  0x3e   : > { %v244_v59 = vpack.c.bf16 %v234_v57, %v233_v56  ;;  %v228_v61 = vld [vmem:[%s1156_s5 + $0x28] sm:$0xff]  ;;  %v235_v62 = vld [vmem:[%s1156_s5 + $0x60] sm:$0xff]  ;;  %v229_v2 = vld [vmem:[%s1156_s5 + $0x30] sm:$0xff]  ;;  %s574_s16 = scalar_lea.sflag [#allocation4], %s1152_s11  ;;  %s968_s7 = sshra.s32 %s590_s4, 4  ;;  %s969_s7 = int_to_ptr.hbm [resolvable:$true] %s968_s7 }
  0x3f   : > { %352 = vmatpush.bf16.msra.mxu0 %v727_v22  ;;  %782 = vmatpush.bf16.msra.mxu2 %v727_v22  ;;  %v236_v63 = vld [vmem:[%s1156_s5 + $0x68] sm:$0xff]  ;;  %v241_v0 = vpack.c.bf16 %v228_v61, %v227_v60  ;;  %v230_v3 = vld [vmem:[%s1156_s5 + $0x38] sm:$0xff]  ;;  %v237_v4 = vld [vmem:[%s1156_s5 + $0x70] sm:$0xff]  ;;  %s970_s8 = scalar_lea.hbm %s969_s7, 4  ;;  %s974_s21 = scalar_lea.hbm %s1291_s3, 8 }
  0x40   : > { %401 = vmatpush.bf16.msra.mxu1 %v731_v23  ;;  %790 = vmatpush.bf16.msra.mxu3 %v731_v23  ;;  %v245_v1 = vpack.c.bf16 %v236_v63, %v235_v62  ;;  %v238_v5 = vld [vmem:[%s1156_s5 + $0x78] sm:$0xff]  ;;  %v242_v6 = vpack.c.bf16 %v230_v3, %v229_v2  ;;  %v263_v26 = vld [vmem:[#allocation7] sm:$0x3]  ;;  %p971_p1 = scmp.ne.s32.totalorder %s969_s7, %s970_s8  ;;  %p975_p11 = scmp.lt.s32.totalorder %s969_s7, %s1291_s3 }
  0x41   : > { %v246_v7 = vpack.c.bf16 %v238_v5, %v237_v4  ;;  %v1204_v30 = vperm.slane %v263_v26, 1  ;;  %p976_p2 = scmp.lt.s32.totalorder %s974_s21, %s970_s8 }
  0x42   : > { %p972_p4 = pnand %p971_p1, %p1119_p3 }
  0x43   : > { %353 = vmatpush.bf16.msra.mxu0 %v719_v28  ;;  %783 = vmatpush.bf16.msra.mxu2 %v719_v28  ;;  %v1200_v28 = vperm.slane %v263_v26, 0  ;;  %p977_p9 = por %p976_p2, %p975_p11 }
  0x44   : > { %402 = vmatpush.bf16.msra.mxu1 %v723_v29  ;;  %791 = vmatpush.bf16.msra.mxu3 %v723_v29  ;;  %p973_p8 = pneg %p972_p4 }
  0x46   : > { %p978_p10 = pnand %p977_p9, %p973_p8 }
  0x47   : > { %354 = vmatpush.bf16.msra.mxu0 %v711_v34  ;;  %784 = vmatpush.bf16.msra.mxu2 %v711_v34 }
  0x48   : > { %403 = vmatpush.bf16.msra.mxu1 %v715_v35  ;;  %792 = vmatpush.bf16.msra.mxu3 %v715_v35 }
  0x4b   : > { %355 = vmatpush.bf16.msra.mxu0 %v703_v40  ;;  %785 = vmatpush.bf16.msra.mxu2 %v703_v40 }
  0x4c   : > { %404 = vmatpush.bf16.msra.mxu1 %v707_v41  ;;  %793 = vmatpush.bf16.msra.mxu3 %v707_v41 }
  0x4f   : > { %356 = vmatpush.bf16.msra.mxu0 %v695_v46  ;;  %786 = vmatpush.bf16.msra.mxu2 %v695_v46 }
  0x50   : > { %405 = vmatpush.bf16.msra.mxu1 %v699_v49  ;;  %794 = vmatpush.bf16.msra.mxu3 %v699_v49 }
  0x52   : > { %357 = vmatmul.bf16.vlgmr.msra.gmra.mxu0 %v239_v52  ;;  %377 = vmatmul.bf16.vlgmr.msra.gmra.mxu2 %v243_v53 }
  0x53   : > { %406 = vmatmul.bf16.vlgmr.msra.gmra.mxu1 %v239_v52  ;;  %426 = vmatmul.bf16.vlgmr.msra.gmra.mxu3 %v243_v53 }
  0x62   : > { %362 = vmatmul.bf16.gmra.mxu0 %v240_v58  ;;  %382 = vmatmul.bf16.gmra.mxu2 %v244_v59 }
  0x63   : > { %411 = vmatmul.bf16.gmra.mxu1 %v240_v58  ;;  %431 = vmatmul.bf16.gmra.mxu3 %v244_v59 }
  0x72   : > { %367 = vmatmul.bf16.gmra.mxu0 %v241_v0  ;;  %387 = vmatmul.bf16.gmra.mxu2 %v245_v1 }
  0x73   : > { %416 = vmatmul.bf16.gmra.mxu1 %v241_v0  ;;  %436 = vmatmul.bf16.gmra.mxu3 %v245_v1 }
  0x82   : > { %372 = vmatmul.bf16.gmra.mxu0 %v242_v6  ;;  %392 = vmatmul.bf16.gmra.mxu2 %v246_v7 }
  0x83   : > { %421 = vmatmul.bf16.gmra.mxu1 %v242_v6  ;;  %441 = vmatmul.bf16.gmra.mxu3 %v246_v7 }
  0xcf   : > { %v358_v8 = vpop.f32.mrf.mxu0 }
  0xd0   : > { %v407_v9 = vpop.f32.mrf.mxu1  ;;  %v359_v35 = vadd.f32 %v358_v8, %v1200_v28 }
  0xd1   : > { %v408_v37 = vadd.f32 %v407_v9, %v1204_v30 }
  0xd2   : > { %v489_v43 = vmul.f32 %v359_v35, %v359_v35 }
  0xd3   : > { %v490_v47 = vmul.f32 %v408_v37, %v408_v37 }
  0xd5   : > { %v1182_v10 = vpop.f32.mrf.mxu2 }
  0xd6   : > { %v1184_v11 = vpop.f32.mrf.mxu3 }
  0xd7   : > { %v360_v12 = vpop.f32.mrf.mxu0 }
  0xd8   : > { %v409_v13 = vpop.f32.mrf.mxu1  ;;  %v361_v32 = vadd.f32 %v360_v12, %v1200_v28 }
  0xd9   : > { %v410_v34 = vadd.f32 %v409_v13, %v1204_v30 }
  0xda   : > { %v491_v39 = vmul.f32 %v361_v32, %v361_v32  ;;  %v447_v44 = vadd.f32 %v361_v32, %v359_v35  ;;  %v379_v32 = vadd.f32 %v1182_v10, %v1200_v28 }
  0xdb   : > { %v492_v41 = vmul.f32 %v410_v34, %v410_v34  ;;  %v468_v48 = vadd.f32 %v410_v34, %v408_v37  ;;  %v428_v37 = vadd.f32 %v1184_v11, %v1204_v30 }
  0xdc   : > { %v521_v53 = vadd.f32 %v491_v39, %v489_v43 }
  0xdd   : > { %v1186_v14 = vpop.f32.mrf.mxu2  ;;  %v542_v59 = vadd.f32 %v492_v41, %v490_v47 }
  0xde   : > { %v1188_v15 = vpop.f32.mrf.mxu3 }
  0xdf   : > { %v363_v16 = vpop.f32.mrf.mxu0 }
  0xe0   : > { %v412_v17 = vpop.f32.mrf.mxu1  ;;  %v364_v36 = vadd.f32 %v363_v16, %v1200_v28 }
  0xe1   : > { %v413_v38 = vadd.f32 %v412_v17, %v1204_v30 }
  0xe2   : > { %v493_v45 = vmul.f32 %v364_v36, %v364_v36  ;;  %v448_v54 = vadd.f32 %v447_v44, %v364_v36 }
  0xe3   : > { %v494_v49 = vmul.f32 %v413_v38, %v413_v38  ;;  %v469_v60 = vadd.f32 %v468_v48, %v413_v38 }
  0xe4   : > { %v522_v63 = vadd.f32 %v521_v53, %v493_v45 }
  0xe5   : > { %v1190_v18 = vpop.f32.mrf.mxu2  ;;  %v543_v3 = vadd.f32 %v542_v59, %v494_v49 }
  0xe6   : > { %v1192_v19 = vpop.f32.mrf.mxu3  ;;  %v384_v11 = vadd.f32 %v1190_v18, %v1200_v28 }
  0xe7   : > { %v365_v20 = vpop.f32.mrf.mxu0 }
  0xe8   : > { %v414_v21 = vpop.f32.mrf.mxu1  ;;  %v366_v40 = vadd.f32 %v365_v20, %v1200_v28 }
  0xe9   : > { %v415_v42 = vadd.f32 %v414_v21, %v1204_v30 }
  0xea   : > { %v495_v55 = vmul.f32 %v366_v40, %v366_v40  ;;  %v449_v0 = vadd.f32 %v448_v54, %v366_v40  ;;  %v506_v54 = vmul.f32 %v428_v37, %v428_v37 }
  0xeb   : > { %v496_v61 = vmul.f32 %v415_v42, %v415_v42  ;;  %v470_v4 = vadd.f32 %v469_v60, %v415_v42  ;;  %v381_v42 = vadd.f32 %v1186_v14, %v1200_v28  ;;  %v433_v14 = vadd.f32 %v1192_v19, %v1204_v30 }
  0xec   : > { %v523_v7 = vadd.f32 %v522_v63, %v495_v55 }
  0xed   : > { %v1194_v22 = vpop.f32.mrf.mxu2  ;;  %v544_v12 = vadd.f32 %v543_v3, %v496_v61  ;;  %v510_v3 = vmul.f32 %v433_v14, %v433_v14 }
  0xee   : > { %v1196_v23 = vpop.f32.mrf.mxu3  ;;  %v386_v59 = vadd.f32 %v1194_v22, %v1200_v28 }
  0xef   : > { %v368_v24 = vpop.f32.mrf.mxu0 }
  0xf0   : > { %v417_v25 = vpop.f32.mrf.mxu1  ;;  %v369_v46 = vadd.f32 %v368_v24, %v1200_v28 }
  0xf1   : > { %v418_v50 = vadd.f32 %v417_v25, %v1204_v30 }
  0xf2   : > { %v497_v1 = vmul.f32 %v369_v46, %v369_v46  ;;  %v450_v8 = vadd.f32 %v449_v0, %v369_v46  ;;  %v430_v46 = vadd.f32 %v1188_v15, %v1204_v30  ;;  %v509_v0 = vmul.f32 %v384_v11, %v384_v11 }
  0xf3   : > { %v498_v5 = vmul.f32 %v418_v50, %v418_v50  ;;  %v471_v13 = vadd.f32 %v470_v4, %v418_v50  ;;  %v505_v50 = vmul.f32 %v379_v32, %v379_v32 }
  0xf4   : > { %v524_v17 = vadd.f32 %v523_v7, %v497_v1  ;;  %v508_v61 = vmul.f32 %v430_v46, %v430_v46 }
  0xf5   : > { %v1198_v27 = vpop.f32.mrf.mxu2  ;;  %v545_v24 = vadd.f32 %v544_v12, %v498_v5 }
  0xf6   : > { %v1202_v29 = vpop.f32.mrf.mxu3  ;;  %v389_v1 = vadd.f32 %v1198_v27, %v1200_v28 }
  0xf7   : > { %v370_v31 = vpop.f32.mrf.mxu0  ;;  %v438_v4 = vadd.f32 %v1202_v29, %v1204_v30 }
  0xf8   : > { %v419_v33 = vpop.f32.mrf.mxu1  ;;  %v371_v56 = vadd.f32 %v370_v31, %v1200_v28 }
  0xf9   : > { %v420_v62 = vadd.f32 %v419_v33, %v1204_v30 }
  0xfa   : > { %v499_v9 = vmul.f32 %v371_v56, %v371_v56  ;;  %v451_v20 = vadd.f32 %v450_v8, %v371_v56 }
  0xfb   : > { %v500_v16 = vmul.f32 %v420_v62, %v420_v62  ;;  %v472_v25 = vadd.f32 %v471_v13, %v420_v62  ;;  %v435_v62 = vadd.f32 %v1196_v23, %v1204_v30 }
  0xfc   : > { %v525_v33 = vadd.f32 %v524_v17, %v499_v9  ;;  %v513_v17 = vmul.f32 %v389_v1, %v389_v1 }
  0xfd   : > { %v1216_v52 = vpop.f32.mrf.mxu2  ;;  %v546_v38 = vadd.f32 %v545_v24, %v500_v16  ;;  %v512_v9 = vmul.f32 %v435_v62, %v435_v62 }
  0xfe   : > { %v1219_v58 = vpop.f32.mrf.mxu3  ;;  %v391_v7 = vadd.f32 %v1216_v52, %v1200_v28 }
  0xff   : > { %v373_v51 = vpop.f32.mrf.mxu0  ;;  %v440_v12 = vadd.f32 %v1219_v58, %v1204_v30 }
 0x100   : > { %v422_v57 = vpop.f32.mrf.mxu1  ;;  %v374_v2 = vadd.f32 %v373_v51, %v1200_v28 }
 0x101   : > { %v423_v6 = vadd.f32 %v422_v57, %v1204_v30  ;;  %v507_v57 = vmul.f32 %v381_v42, %v381_v42  ;;  %v516_v58 = vmul.f32 %v440_v12, %v440_v12 }
 0x102   : > { %v501_v21 = vmul.f32 %v374_v2, %v374_v2  ;;  %v452_v34 = vadd.f32 %v451_v20, %v374_v2 }
 0x103   : > { %v502_v26 = vmul.f32 %v423_v6, %v423_v6  ;;  %v473_v39 = vadd.f32 %v472_v25, %v423_v6  ;;  %v511_v6 = vmul.f32 %v386_v59, %v386_v59  ;;  %v514_v25 = vmul.f32 %v438_v4, %v438_v4 }
 0x104   : > { %v526_v43 = vadd.f32 %v525_v33, %v501_v21 }
 0x105   : > { %v393_v41 = vpop.f32.mrf.mxu2  ;;  %v547_v47 = vadd.f32 %v546_v38, %v502_v26 }
 0x106   : > { %v442_v10 = vpop.f32.mrf.mxu3  ;;  %v394_v20 = vadd.f32 %v393_v41, %v1200_v28 }
 0x107   : > { %v375_v31 = vpop.f32.mrf.mxu0  ;;  %v443_v26 = vadd.f32 %v442_v10, %v1204_v30 }
 0x108   : > { %v376_v35 = vadd.f32 %v375_v31, %v1200_v28  ;;  %v424_v36 = vpop.f32.mrf.mxu1 }
 0x109   : > { %v425_v40 = vadd.f32 %v424_v36, %v1204_v30 }
 0x10a   : > { %v453_v44 = vadd.f32 %v452_v34, %v376_v35  ;;  %v503_v45 = vmul.f32 %v376_v35, %v376_v35 }
 0x10b   : > { %v474_v48 = vadd.f32 %v473_v39, %v425_v40  ;;  %v504_v49 = vmul.f32 %v425_v40, %v425_v40  ;;  %v517_v40 = vmul.f32 %v394_v20, %v394_v20 }
 0x10c   : > { %v454_v51 = vadd.f32 %v453_v44, %v379_v32  ;;  %v527_v53 = vadd.f32 %v526_v43, %v503_v45  ;;  %v515_v32 = vmul.f32 %v391_v7, %v391_v7  ;;  %v518_v43 = vmul.f32 %v443_v26, %v443_v26 }
 0x10d   : > { %v475_v55 = vadd.f32 %v474_v48, %v428_v37  ;;  %v548_v56 = vadd.f32 %v547_v47, %v504_v49  ;;  %v395_v16 = vpop.f32.mrf.mxu2 }
 0x10e   : > { %v455_v15 = vadd.f32 %v454_v51, %v381_v42  ;;  %v528_v60 = vadd.f32 %v527_v53, %v505_v50  ;;  %v444_v24 = vpop.f32.mrf.mxu3  ;;  %v396_v35 = vadd.f32 %v395_v16, %v1200_v28 }
 0x10f   : > { %v476_v63 = vadd.f32 %v475_v55, %v430_v46  ;;  %v549_v18 = vadd.f32 %v548_v56, %v506_v54  ;;  %v445_v38 = vadd.f32 %v444_v24, %v1204_v30 }
 0x110   : > { %v456_v2 = vadd.f32 %v455_v15, %v384_v11  ;;  %v529_v19 = vadd.f32 %v528_v60, %v507_v57  ;;  %v519_v46 = vmul.f32 %v396_v35, %v396_v35 }
 0x111   : > { %v477_v5 = vadd.f32 %v476_v63, %v433_v14  ;;  %v550_v22 = vadd.f32 %v549_v18, %v508_v61  ;;  %v520_v49 = vmul.f32 %v445_v38, %v445_v38 }
 0x112   : > { %v530_v8 = vadd.f32 %v529_v19, %v509_v0  ;;  %v457_v23 = vadd.f32 %v456_v2, %v386_v59 }
 0x113   : > { %v551_v13 = vadd.f32 %v550_v22, %v510_v3  ;;  %v478_v27 = vadd.f32 %v477_v5, %v435_v62 }
 0x114   : > { %v458_v21 = vadd.f32 %v457_v23, %v389_v1  ;;  %v531_v29 = vadd.f32 %v530_v8, %v511_v6 }
 0x115   : > { %v479_v31 = vadd.f32 %v478_v27, %v438_v4  ;;  %v552_v52 = vadd.f32 %v551_v13, %v512_v9 }
 0x116   : > { %v459_v33 = vadd.f32 %v458_v21, %v391_v7  ;;  %v532_v34 = vadd.f32 %v531_v29, %v513_v17 }
 0x117   : > { %v480_v36 = vadd.f32 %v479_v31, %v440_v12  ;;  %v553_v37 = vadd.f32 %v552_v52, %v514_v25 }
 0x118   : > { %v460_v39 = vadd.f32 %v459_v33, %v394_v20  ;;  %v533_v41 = vadd.f32 %v532_v34, %v515_v32 }
 0x119   : > { %v481_v42 = vadd.f32 %v480_v36, %v443_v26  ;;  %v554_v44 = vadd.f32 %v553_v37, %v516_v58 }
 0x11a   : > { %v534_v45 = vadd.f32 %v533_v41, %v517_v40  ;;  %v461_v10 = vadd.f32 %v460_v39, %v396_v35 }
 0x11b   : > { %v555_v47 = vadd.f32 %v554_v44, %v518_v43  ;;  %v482_v48 = vadd.f32 %v481_v42, %v445_v38 }
 0x11c   : > { %v462_v50 = vrot.slane %v461_v10, 4  ;;  %v535_v11 = vadd.f32 %v534_v45, %v519_v46 }
 0x11d   : > { %v483_v28 = vrot.slane %v482_v48, 4  ;;  %v556_v51 = vadd.f32 %v555_v47, %v520_v49 }
 0x11e   : > { %v463_v53 = vadd.f32 %v462_v50, %v461_v10  ;;  %v536_v30 = vrot.slane %v535_v11, 4 }
 0x11f   : > { %v484_v54 = vadd.f32 %v483_v28, %v482_v48  ;;  %v557_v14 = vrot.slane %v556_v51, 4 }
 0x120   : > { %v464_v55 = vrot.slane %v463_v53, 2  ;;  %v537_v56 = vadd.f32 %v536_v30, %v535_v11 }
 0x121   : > { %v485_v57 = vrot.slane %v484_v54, 2  ;;  %v558_v59 = vadd.f32 %v557_v14, %v556_v51 }
 0x122   : > { %v538_v15 = vrot.slane %v537_v56, 2  ;;  %v465_v62 = vadd.f32 %v464_v55, %v463_v53 }
 0x123   : > { %v486_v60 = vadd.f32 %v485_v57, %v484_v54  ;;  %v559_v61 = vrot.slane %v558_v59, 2 }
 0x124   : > { %v539_v63 = vadd.f32 %v538_v15, %v537_v56  ;;  %v466_v19 = vrot.slane %v465_v62, 1 }
 0x125   : > { %v487_v18 = vrot.slane %v486_v60, 1  ;;  %v560_v0 = vadd.f32 %v559_v61, %v558_v59 }
 0x126   : > { %v540_v1 = vrot.slane %v539_v63, 1  ;;  %v467_v22 = vadd.f32 %v466_v19, %v465_v62 }
 0x127   : > { %v561_v2 = vrot.slane %v560_v0, 1  ;;  %v488_v3 = vadd.f32 %v487_v18, %v486_v60 }
 0x128   : > { %v541_v5 = vadd.f32 %v540_v1, %v539_v63 }
 0x129   : > { %v562_v4 = vadd.f32 %v561_v2, %v560_v0 }
 0x12a   : > { %v564_v8 = vsel %vm563_vm0, %v467_v22, %v541_v5 }
 0x12b   : > { %v565_v6 = vsel %vm563_vm0, %v488_v3, %v562_v4 }
 0x12c   : > { %v568_v7 = vrot.slane %v565_v6, 6 }
 0x12e   : > { %v570_v23 = vsel %vm569_vm1, %v564_v8, %v568_v7 }
 0x12f   : > { %572 = vst [vmem:[%s221_s27] sm:$0xf] %v570_v23 }
 0x130   : > { %981 = shalt.err (!%p978_p10)
}
 0x131   : > { %805 = dma.vmem_to_hbm [thread:$0]  (%p1119_p3), %s588_s28, 64, %s590_s4, %s574_s16  }
 0x132 PF: > { %s601_s11 = sand.u32 1, %s1012_s12   ;;  %p1297_p12 = scmp.ge.s32.totalorder %s1024_s15, 2 }
 0x133   : > { %s602_s25 = scalar_lea.sflag [#allocation4], %s601_s11 }
 0x134   : > { %p819_p13 = pnand %p1297_p12, %p1085_p6 }
 0x136   : > { %p820_p0 = pneg %p819_p13 }
 0x138   : > { %1007 = dma.done.wait (%p820_p0), %s602_s25, 64  }
 0x139   : > { %1009 = vsyncadd (%p820_p0), %s602_s25, 4294967232  ;;  %p17_p5 = scmp.ge.s32.totalorder %s1109_s6, 4   ;;  %s1298_s12 = smov %s1016_s13 }
 0x13a   : > { %s1299_s13 = smov %s1020_s14  ;;  %s1300_s14 = smov %s1125_s10 }
 0x13b   : > { %s1301_s15 = smov %s1109_s6  ;;  %19 = sbr.rel (!%p17_p5) target bundleno = 6 (0x6), region = 85 }
 0x140   :  { %608 = vsyncpa [#allocation3], 1 }
 0x141   :  { %610 = vsyncpa [#allocation3 + $0x1], 1 }
 0x142   :  { %611 = vsyncpa [#allocation6], 1 }
 0x143   :  { %612 = vsyncpa [#allocation4], 1 }
 0x144   :  { %614 = vsyncpa [#allocation4 + $0x1], 1 }

</bundles_post_ra>
